<compile_context>
chip_gen: v5e
topology: v5e:2x2
jax: 0.10.0
libtpu: 0.0.40
codegen_flags: <defaults>
</compile_context>

<pallas_src>
import functools
import math

import jax
import jax.numpy as jnp
from jax.experimental import pallas as pl
from jax.experimental.pallas import tpu as pltpu


_EPS_F32 = 4e-3      # PoincareBall eps for float32 (hgcn manifolds)
_MIN_NORM = 1e-15    # PoincareBall min_norm
_SUBLANE = 8         # f32 sublane tile height; keep packed slices aligned


def _row_norm(x):
    return jnp.sqrt(jnp.sum(x * x, axis=-1, keepdims=True))


def _rnd(r, mult=_SUBLANE):
    return ((r + mult - 1) // mult) * mult


def _pack_layout(num_features, hidden, num_layers):
    """Sublane-aligned row offsets inside the packed parameter buffer packA."""
    off_w0 = 0
    off_b0 = off_w0 + _rnd(num_features)
    off_wc = off_b0 + _rnd(1)
    per_layer = _rnd(hidden)
    total = off_wc + num_layers * per_layer
    return off_b0, off_wc, per_layer, total


def gcn2_hbpu_kernel(x_ref, adj_ref, pa_ref, e_ref, pb_ref, out_ref, *,
                     alpha, betas, c, hidden, off_b0, off_wc, per_layer):
    f32 = jnp.float32
    sqrt_c = f32(math.sqrt(c))
    maxnorm = f32((1.0 - _EPS_F32) / math.sqrt(c))

    x = x_ref[...]
    adj = adj_ref[...]
    num_features = x.shape[1]
    h_dim = hidden
    hh = h_dim * h_dim

    # --- lins[0] + ReLU  ->  h = h_0   (dropout p=0.0 is identity) ----------
    w0 = pa_ref[0:num_features, :]
    b0 = pa_ref[off_b0:off_b0 + 1, :]
    h0 = jnp.maximum(
        jnp.dot(x, w0, preferred_element_type=jnp.float32) + b0, 0.0)
    h = h0

    # --- GCN2Conv stack (normalize=False, shared_weights), ReLU each --------
    for l, beta in enumerate(betas):
        wl = pa_ref[off_wc + l * per_layer: off_wc + l * per_layer + h_dim, :]
        agg = jnp.dot(adj, h, preferred_element_type=jnp.float32)   # propagate
        support = f32(1.0 - alpha) * agg + f32(alpha) * h0
        h = jnp.maximum(
            f32(1.0 - beta) * support
            + f32(beta) * jnp.dot(support, wl,
                                  preferred_element_type=jnp.float32),
            0.0)

    # --- flattened outer product via ONE merged selector matmul -------------
    #   flat[i, a*H + b] = h[i,a] * h[i,b];  E = [Ea | Eb] of shape (H, 2*H*H)
    he = jnp.dot(h, e_ref[...], preferred_element_type=jnp.float32)  # (N,2HH)
    o = he[:, :hh] * he[:, hh:]          # lane-aligned split at 256 -> free

    # --- manifold.proj (clamp rows to the Poincare ball) --------------------
    n_o = jnp.maximum(_row_norm(o), _MIN_NORM)
    p = jnp.where(n_o > maxnorm,
                  o * (maxnorm * pl.reciprocal(n_o, approx=True)), o)

    # --- proj_tan0(logmap0(p, c), c) — proj_tan0 is identity ----------------
    # Post-proj norm is exactly min(n_o, maxnorm); reuse it (no new reduce).
    n_p = jnp.minimum(n_o, maxnorm)
    y = jnp.clip(sqrt_c * n_p, -1.0 + 1e-7, 1.0 - 1e-7)
    artanh = f32(0.5) * jnp.log((1.0 + y) / (1.0 - y))
    h_euc = p * (artanh * pl.reciprocal(sqrt_c * n_p, approx=True))

    # --- folded lins[1] o lins[2]:  z = h_euc @ (w1@w2) + (b1@w2 + b2) ------
    w12 = pb_ref[0:hh, :]
    b12 = pb_ref[hh:hh + 1, :]
    z = jnp.dot(h_euc, w12, preferred_element_type=jnp.float32) + b12

    # --- expmap0(proj_tan0(z, c), c) then proj -------------------------------
    n_z = jnp.maximum(_row_norm(z), _MIN_NORM)
    g = z * (jnp.tanh(sqrt_c * n_z) * pl.reciprocal(sqrt_c * n_z, approx=True))
    n_g = jnp.maximum(_row_norm(g), _MIN_NORM)
    g = jnp.where(n_g > maxnorm,
                  g * (maxnorm * pl.reciprocal(n_g, approx=True)), g)

    # --- exact log_softmax over the class axis -------------------------------
    m = jnp.max(g, axis=-1, keepdims=True)
    s = g - m
    lse = jnp.log(jnp.sum(jnp.exp(s), axis=-1, keepdims=True))
    out_ref[...] = s - lse


_VMEM = pl.BlockSpec(memory_space=pltpu.MemorySpace.VMEM)


def gcn2_hbpu_forward(x, adj, params, *, alpha, theta, c, num_layers, hidden):
    """Full GCN2_HBPU.forward in one pallas_call (all intermediates in VMEM)."""
    n = x.shape[0]
    num_features = x.shape[1]
    num_classes = params["packB"].shape[1]
    off_b0, off_wc, per_layer, _ = _pack_layout(num_features, hidden, num_layers)
    # GCN2Conv beta for layer index l (module passes layer+1, 1-indexed)
    betas = tuple(math.log(theta / (l + 1) + 1.0) for l in range(num_layers))
    kernel = functools.partial(
        gcn2_hbpu_kernel, alpha=alpha, betas=betas, c=c, hidden=hidden,
        off_b0=off_b0, off_wc=off_wc, per_layer=per_layer)
    # Gridless single launch: the whole graph fits VMEM at these sizes.
    # TODO(synk): at large N, grid over node rows (parallel dimension
    # semantics for v7x's 2nd TensorCore) and tile / bf16-cast adj.
    return pl.pallas_call(
        kernel,
        out_shape=jax.ShapeDtypeStruct((n, num_classes), jnp.float32),
        in_specs=[_VMEM] * 5,
        out_specs=_VMEM,
    )(x, adj, params["packA"], params["e"], params["packB"])


# ----------------------------------------------------------------------------
# Deterministic parameter construction.  Linear weights are stored [in, out]
# (transpose of torch.nn.Linear's [out, in]) so the kernel computes x @ W.
# Small parameters are packed into two sublane-aligned buffers so the kernel
# issues only 5 input DMAs.
# ----------------------------------------------------------------------------
def _pad_rows(a, mult=_SUBLANE):
    pad = (-a.shape[0]) % mult
    if pad:
        a = jnp.concatenate([a, jnp.zeros((pad, a.shape[1]), a.dtype)], axis=0)
    return a


def make_params(key, num_features, hidden, num_layers, num_classes):
    ks = jax.random.split(key, 7)

    def lin_w(k, i, o):
        return (jax.random.normal(k, (i, o), jnp.float32)
                * jnp.float32(1.0 / math.sqrt(i)))

    def lin_b(k, o):
        return jax.random.normal(k, (1, o), jnp.float32) * jnp.float32(0.02)

    w0 = lin_w(ks[0], num_features, hidden)
    b0 = lin_b(ks[1], hidden)
    w1 = lin_w(ks[2], hidden * hidden, 64)
    b1 = lin_b(ks[3], 64)
    w2 = lin_w(ks[4], 64, num_classes)
    b2 = lin_b(ks[5], num_classes)

    # GCN2Conv weight1 per layer, used as `support @ weight1` (shared_weights).
    wc = (jax.random.normal(ks[6], (num_layers, hidden, hidden), jnp.float32)
          * jnp.float32(1.0 / math.sqrt(hidden)))

    # Fold lins[1] o lins[2] (no nonlinearity / dropout=0 between them).
    w12 = w1 @ w2                      # (H*H, num_classes)
    b12 = b1 @ w2 + b2                 # (1, num_classes)

    # Merged selector E = [Ea | Eb] for the flattened outer product:
    #   Ea[a, a*H + b] = 1,  Eb[b, a*H + b] = 1   ->  E: (H, 2*H*H)
    cols = jnp.arange(hidden * hidden)
    rows = jnp.arange(hidden)[:, None]
    ea = ((cols[None, :] // hidden) == rows).astype(jnp.float32)
    eb = ((cols[None, :] % hidden) == rows).astype(jnp.float32)
    e = jnp.concatenate([ea, eb], axis=1)

    # Packed buffers (sublane-aligned row segments, sliced statically in-kernel)
    pack_a = jnp.concatenate(
        [_pad_rows(w0), _pad_rows(b0)]
        + [_pad_rows(wc[l]) for l in range(num_layers)], axis=0)
    pack_b = jnp.concatenate([w12, b12], axis=0)

    return {"packA": pack_a, "packB": pack_b, "e": e}


# ----------------------------------------------------------------------------
# Pure-JAX reference (direct outer product, same packed weights) used only to
# sanity-check the kernel output in __main__.
# ----------------------------------------------------------------------------
def gcn2_hbpu_reference(x, adj, params, *, alpha, theta, c, num_layers, hidden):
    num_features = x.shape[1]
    off_b0, off_wc, per_layer, _ = _pack_layout(num_features, hidden, num_layers)
    pa, pb = params["packA"], params["packB"]
    hh = hidden * hidden
    w0, b0 = pa[0:num_features], pa[off_b0:off_b0 + 1]
    w12, b12 = pb[0:hh], pb[hh:hh + 1]
    sqrt_c = math.sqrt(c)
    maxnorm = (1.0 - _EPS_F32) / sqrt_c

    h0 = jnp.maximum(x @ w0 + b0, 0.0)
    h = h0
    for l in range(num_layers):
        beta = math.log(theta / (l + 1) + 1.0)
        wl = pa[off_wc + l * per_layer: off_wc + l * per_layer + hidden]
        support = (1.0 - alpha) * (adj @ h) + alpha * h0
        h = jnp.maximum((1.0 - beta) * support + beta * (support @ wl), 0.0)

    o = (h[:, :, None] * h[:, None, :]).reshape(h.shape[0], hh)
    n_o = jnp.maximum(jnp.linalg.norm(o, axis=-1, keepdims=True), _MIN_NORM)
    p = jnp.where(n_o > maxnorm, o / n_o * maxnorm, o)
    n_p = jnp.maximum(jnp.linalg.norm(p, axis=-1, keepdims=True), _MIN_NORM)
    y = jnp.clip(sqrt_c * n_p, -1.0 + 1e-7, 1.0 - 1e-7)
    h_euc = p * (jnp.arctanh(y) / (sqrt_c * n_p))
    z = h_euc @ w12 + b12
    n_z = jnp.maximum(jnp.linalg.norm(z, axis=-1, keepdims=True), _MIN_NORM)
    g = z * jnp.tanh(sqrt_c * n_z) / (sqrt_c * n_z)
    n_g = jnp.maximum(jnp.linalg.norm(g, axis=-1, keepdims=True), _MIN_NORM)
    g = jnp.where(n_g > maxnorm, g / n_g * maxnorm, g)
    return jax.nn.log_softmax(g, axis=-1)


# ----------------------------------------------------------------------------
if __name__ == "__main__":
    key = jax.random.PRNGKey(0)

    # Small shapes consistent with the module: hidden_channels**2 feeds lins[1].
    num_nodes = 16
    num_features = 8
    hidden_channels = 16          # hidden^2 = 256 -> lane-dense intermediate
    num_classes = 4
    num_layers = 2
    num_edges = 40
    alpha, theta, curvature = 0.1, 0.5, 1.0

    k_x, k_src, k_dst, k_p = jax.random.split(key, 4)

    x = jax.random.normal(k_x, (num_nodes, num_features), jnp.float32)

    # Dense adj_t: adj[i, j] = 1 iff edge j -> i (row i aggregates in-neighbors).
    # GCN2Conv(normalize=False) uses the raw adjacency values.
    src = jax.random.randint(k_src, (num_edges,), 0, num_nodes)
    dst = jax.random.randint(k_dst, (num_edges,), 0, num_nodes)
    loop = jnp.arange(num_nodes)
    src = jnp.concatenate([src, loop])
    dst = jnp.concatenate([dst, loop])
    adj = jnp.zeros((num_nodes, num_nodes), jnp.float32).at[dst, src].set(1.0)

    params = make_params(k_p, num_features, hidden_channels, num_layers,
                         num_classes)

    # TODO(synk): regularizer() / reset_parameters() are training-time
    # utilities outside forward() and are not implemented as kernels.
    fwd = jax.jit(functools.partial(
        gcn2_hbpu_forward, alpha=alpha, theta=theta, c=curvature,
        num_layers=num_layers, hidden=hidden_channels))
    out = jax.block_until_ready(fwd(x, adj, params))

    assert out.shape == (num_nodes, num_classes)
    # log_softmax rows must sum to 1 in probability space.
    assert bool(jnp.all(jnp.abs(jnp.sum(jnp.exp(out), axis=1) - 1.0) < 1e-4))

    # Loose parity vs. a pure-JAX reference (EUP approx reciprocals introduce
    # ~1e-3-relative deviations; this catches semantic bugs, not ulp drift).
    ref = gcn2_hbpu_reference(x, adj, params, alpha=alpha, theta=theta,
                              c=curvature, num_layers=num_layers,
                              hidden=hidden_channels)
    assert bool(jnp.max(jnp.abs(out - ref)) < 5e-2)

    print("KERNEL_OK")
</pallas_src>

<mosaic_0001>
module attributes {stable_mosaic.version = 11 : i64} {
  func.func @gcn2_hbpu_kernel(%arg0: memref<16x8xf32, #tpu.memory_space<vmem>>, %arg1: memref<16x16xf32, #tpu.memory_space<vmem>>, %arg2: memref<48x16xf32, #tpu.memory_space<vmem>>, %arg3: memref<16x512xf32, #tpu.memory_space<vmem>>, %arg4: memref<257x4xf32, #tpu.memory_space<vmem>>, %arg5: memref<16x4xf32, #tpu.memory_space<vmem>>) attributes {dimension_semantics = [], scalar_prefetch = 0 : i64, scratch_operands = 0 : i64, tpu.core_type = #tpu.core_type<tc>} {
    %c0 = arith.constant 0 : index
    %c0_0 = arith.constant 0 : index
    %0 = vector.load %arg0[%c0, %c0_0] : memref<16x8xf32, #tpu.memory_space<vmem>>, vector<16x8xf32>
    %c0_1 = arith.constant 0 : index
    %c0_2 = arith.constant 0 : index
    %1 = vector.load %arg1[%c0_1, %c0_2] : memref<16x16xf32, #tpu.memory_space<vmem>>, vector<16x16xf32>
    %c0_3 = arith.constant 0 : index
    %c0_4 = arith.constant 0 : index
    %2 = vector.load %arg2[%c0_3, %c0_4] : memref<48x16xf32, #tpu.memory_space<vmem>>, vector<8x16xf32>
    %c8 = arith.constant 8 : index
    %c0_5 = arith.constant 0 : index
    %3 = vector.load %arg2[%c8, %c0_5] : memref<48x16xf32, #tpu.memory_space<vmem>>, vector<1x16xf32>
    %cst = arith.constant dense<0.000000e+00> : vector<16x16xf32>
    %4 = tpu.matmul %0, %2, %cst {dimension_numbers = #tpu.dot_dimension_numbers<[1], [0], [0], [1], [0, 0, 1, 1], [], []>} : vector<16x8xf32>, vector<8x16xf32>, vector<16x16xf32> -> vector<16x16xf32>
    %5 = vector.broadcast %3 : vector<1x16xf32> to vector<16x16xf32>
    %6 = arith.addf %4, %5 : vector<16x16xf32>
    %cst_6 = arith.constant 0.000000e+00 : f32
    %7 = vector.broadcast %cst_6 : f32 to vector<16x16xf32>
    %8 = arith.maximumf %6, %7 : vector<16x16xf32>
    %c16 = arith.constant 16 : index
    %c0_7 = arith.constant 0 : index
    %9 = vector.load %arg2[%c16, %c0_7] : memref<48x16xf32, #tpu.memory_space<vmem>>, vector<16x16xf32>
    %cst_8 = arith.constant dense<0.000000e+00> : vector<16x16xf32>
    %10 = tpu.matmul %1, %8, %cst_8 {dimension_numbers = #tpu.dot_dimension_numbers<[1], [0], [0], [1], [0, 0, 1, 1], [], []>} : vector<16x16xf32>, vector<16x16xf32>, vector<16x16xf32> -> vector<16x16xf32>
    %cst_9 = arith.constant 0.899999976 : f32
    %11 = vector.broadcast %cst_9 : f32 to vector<16x16xf32>
    %12 = arith.mulf %11, %10 : vector<16x16xf32>
    %cst_10 = arith.constant 1.000000e-01 : f32
    %13 = vector.broadcast %cst_10 : f32 to vector<16x16xf32>
    %14 = arith.mulf %13, %8 : vector<16x16xf32>
    %15 = arith.addf %12, %14 : vector<16x16xf32>
    %cst_11 = arith.constant 0.594534874 : f32
    %16 = vector.broadcast %cst_11 : f32 to vector<16x16xf32>
    %17 = arith.mulf %16, %15 : vector<16x16xf32>
    %cst_12 = arith.constant dense<0.000000e+00> : vector<16x16xf32>
    %18 = tpu.matmul %15, %9, %cst_12 {dimension_numbers = #tpu.dot_dimension_numbers<[1], [0], [0], [1], [0, 0, 1, 1], [], []>} : vector<16x16xf32>, vector<16x16xf32>, vector<16x16xf32> -> vector<16x16xf32>
    %cst_13 = arith.constant 0.405465096 : f32
    %19 = vector.broadcast %cst_13 : f32 to vector<16x16xf32>
    %20 = arith.mulf %19, %18 : vector<16x16xf32>
    %21 = arith.addf %17, %20 : vector<16x16xf32>
    %cst_14 = arith.constant 0.000000e+00 : f32
    %22 = vector.broadcast %cst_14 : f32 to vector<16x16xf32>
    %23 = arith.maximumf %21, %22 : vector<16x16xf32>
    %c32 = arith.constant 32 : index
    %c0_15 = arith.constant 0 : index
    %24 = vector.load %arg2[%c32, %c0_15] : memref<48x16xf32, #tpu.memory_space<vmem>>, vector<16x16xf32>
    %cst_16 = arith.constant dense<0.000000e+00> : vector<16x16xf32>
    %25 = tpu.matmul %1, %23, %cst_16 {dimension_numbers = #tpu.dot_dimension_numbers<[1], [0], [0], [1], [0, 0, 1, 1], [], []>} : vector<16x16xf32>, vector<16x16xf32>, vector<16x16xf32> -> vector<16x16xf32>
    %cst_17 = arith.constant 0.899999976 : f32
    %26 = vector.broadcast %cst_17 : f32 to vector<16x16xf32>
    %27 = arith.mulf %26, %25 : vector<16x16xf32>
    %cst_18 = arith.constant 1.000000e-01 : f32
    %28 = vector.broadcast %cst_18 : f32 to vector<16x16xf32>
    %29 = arith.mulf %28, %8 : vector<16x16xf32>
    %30 = arith.addf %27, %29 : vector<16x16xf32>
    %cst_19 = arith.constant 0.776856422 : f32
    %31 = vector.broadcast %cst_19 : f32 to vector<16x16xf32>
    %32 = arith.mulf %31, %30 : vector<16x16xf32>
    %cst_20 = arith.constant dense<0.000000e+00> : vector<16x16xf32>
    %33 = tpu.matmul %30, %24, %cst_20 {dimension_numbers = #tpu.dot_dimension_numbers<[1], [0], [0], [1], [0, 0, 1, 1], [], []>} : vector<16x16xf32>, vector<16x16xf32>, vector<16x16xf32> -> vector<16x16xf32>
    %cst_21 = arith.constant 0.223143548 : f32
    %34 = vector.broadcast %cst_21 : f32 to vector<16x16xf32>
    %35 = arith.mulf %34, %33 : vector<16x16xf32>
    %36 = arith.addf %32, %35 : vector<16x16xf32>
    %cst_22 = arith.constant 0.000000e+00 : f32
    %37 = vector.broadcast %cst_22 : f32 to vector<16x16xf32>
    %38 = arith.maximumf %36, %37 : vector<16x16xf32>
    %c0_23 = arith.constant 0 : index
    %c0_24 = arith.constant 0 : index
    %39 = vector.load %arg3[%c0_23, %c0_24] : memref<16x512xf32, #tpu.memory_space<vmem>>, vector<16x512xf32>
    %cst_25 = arith.constant dense<0.000000e+00> : vector<16x512xf32>
    %40 = tpu.matmul %38, %39, %cst_25 {dimension_numbers = #tpu.dot_dimension_numbers<[1], [0], [0], [1], [0, 0, 1, 1], [], []>} : vector<16x16xf32>, vector<16x512xf32>, vector<16x512xf32> -> vector<16x512xf32>
    %41 = vector.extract_strided_slice %40 {offsets = [0, 0], sizes = [16, 256], strides = [1, 1]} : vector<16x512xf32> to vector<16x256xf32>
    %42 = vector.extract_strided_slice %40 {offsets = [0, 256], sizes = [16, 256], strides = [1, 1]} : vector<16x512xf32> to vector<16x256xf32>
    %43 = arith.mulf %41, %42 : vector<16x256xf32>
    %44 = arith.mulf %43, %43 : vector<16x256xf32>
    %cst_26 = arith.constant dense<0.000000e+00> : vector<16xf32>
    %45 = vector.multi_reduction <add>, %44, %cst_26 [1] : vector<16x256xf32> to vector<16xf32>
    %46 = vector.shape_cast %45 : vector<16xf32> to vector<16x1xf32>
    %47 = math.sqrt %46 : vector<16x1xf32>
    %cst_27 = arith.constant 1.000000e-15 : f32
    %48 = vector.broadcast %cst_27 : f32 to vector<16x1xf32>
    %49 = arith.maximumf %47, %48 : vector<16x1xf32>
    %cst_28 = arith.constant 0.995999991 : f32
    %50 = vector.broadcast %cst_28 : f32 to vector<16x1xf32>
    %51 = arith.cmpf ogt, %49, %50 : vector<16x1xf32>
    %52 = tpu.reciprocal %49 {approx = true} : vector<16x1xf32> -> vector<16x1xf32>
    %cst_29 = arith.constant 0.995999991 : f32
    %53 = vector.broadcast %cst_29 : f32 to vector<16x1xf32>
    %54 = arith.mulf %53, %52 : vector<16x1xf32>
    %55 = vector.broadcast %54 : vector<16x1xf32> to vector<16x256xf32>
    %56 = arith.mulf %43, %55 : vector<16x256xf32>
    %57 = vector.shape_cast %51 : vector<16x1xi1> to vector<16x1xi1>
    %58 = vector.broadcast %57 : vector<16x1xi1> to vector<16x256xi1>
    %59 = arith.select %58, %56, %43 : vector<16x256xi1>, vector<16x256xf32>
    %cst_30 = arith.constant 0.995999991 : f32
    %60 = vector.broadcast %cst_30 : f32 to vector<16x1xf32>
    %61 = arith.minimumf %49, %60 : vector<16x1xf32>
    %cst_31 = arith.constant 1.000000e+00 : f32
    %62 = vector.broadcast %cst_31 : f32 to vector<16x1xf32>
    %63 = arith.mulf %62, %61 : vector<16x1xf32>
    %cst_32 = arith.constant -0.99999988 : f32
    %cst_33 = arith.constant 0.99999988 : f32
    %64 = vector.broadcast %cst_32 : f32 to vector<16x1xf32>
    %65 = arith.maximumf %64, %63 : vector<16x1xf32>
    %66 = vector.broadcast %cst_33 : f32 to vector<16x1xf32>
    %67 = arith.minimumf %66, %65 : vector<16x1xf32>
    %cst_34 = arith.constant 1.000000e+00 : f32
    %68 = vector.broadcast %cst_34 : f32 to vector<16x1xf32>
    %69 = arith.addf %68, %67 : vector<16x1xf32>
    %cst_35 = arith.constant 1.000000e+00 : f32
    %70 = vector.broadcast %cst_35 : f32 to vector<16x1xf32>
    %71 = arith.subf %70, %67 : vector<16x1xf32>
    %72 = arith.divf %69, %71 : vector<16x1xf32>
    %73 = math.log %72 : vector<16x1xf32>
    %cst_36 = arith.constant 5.000000e-01 : f32
    %74 = vector.broadcast %cst_36 : f32 to vector<16x1xf32>
    %75 = arith.mulf %74, %73 : vector<16x1xf32>
    %cst_37 = arith.constant 1.000000e+00 : f32
    %76 = vector.broadcast %cst_37 : f32 to vector<16x1xf32>
    %77 = arith.mulf %76, %61 : vector<16x1xf32>
    %78 = tpu.reciprocal %77 {approx = true} : vector<16x1xf32> -> vector<16x1xf32>
    %79 = arith.mulf %75, %78 : vector<16x1xf32>
    %80 = vector.broadcast %79 : vector<16x1xf32> to vector<16x256xf32>
    %81 = arith.mulf %59, %80 : vector<16x256xf32>
    %c0_38 = arith.constant 0 : index
    %c0_39 = arith.constant 0 : index
    %82 = vector.load %arg4[%c0_38, %c0_39] : memref<257x4xf32, #tpu.memory_space<vmem>>, vector<256x4xf32>
    %c256 = arith.constant 256 : index
    %c0_40 = arith.constant 0 : index
    %83 = vector.load %arg4[%c256, %c0_40] : memref<257x4xf32, #tpu.memory_space<vmem>>, vector<1x4xf32>
    %cst_41 = arith.constant dense<0.000000e+00> : vector<16x4xf32>
    %84 = tpu.matmul %81, %82, %cst_41 {dimension_numbers = #tpu.dot_dimension_numbers<[1], [0], [0], [1], [0, 0, 1, 1], [], []>} : vector<16x256xf32>, vector<256x4xf32>, vector<16x4xf32> -> vector<16x4xf32>
    %85 = vector.broadcast %83 : vector<1x4xf32> to vector<16x4xf32>
    %86 = arith.addf %84, %85 : vector<16x4xf32>
    %87 = arith.mulf %86, %86 : vector<16x4xf32>
    %cst_42 = arith.constant dense<0.000000e+00> : vector<16xf32>
    %88 = vector.multi_reduction <add>, %87, %cst_42 [1] : vector<16x4xf32> to vector<16xf32>
    %89 = vector.shape_cast %88 : vector<16xf32> to vector<16x1xf32>
    %90 = math.sqrt %89 : vector<16x1xf32>
    %cst_43 = arith.constant 1.000000e-15 : f32
    %91 = vector.broadcast %cst_43 : f32 to vector<16x1xf32>
    %92 = arith.maximumf %90, %91 : vector<16x1xf32>
    %cst_44 = arith.constant 1.000000e+00 : f32
    %93 = vector.broadcast %cst_44 : f32 to vector<16x1xf32>
    %94 = arith.mulf %93, %92 : vector<16x1xf32>
    %95 = math.tanh %94 : vector<16x1xf32>
    %cst_45 = arith.constant 1.000000e+00 : f32
    %96 = vector.broadcast %cst_45 : f32 to vector<16x1xf32>
    %97 = arith.mulf %96, %92 : vector<16x1xf32>
    %98 = tpu.reciprocal %97 {approx = true} : vector<16x1xf32> -> vector<16x1xf32>
    %99 = arith.mulf %95, %98 : vector<16x1xf32>
    %100 = vector.broadcast %99 : vector<16x1xf32> to vector<16x4xf32>
    %101 = arith.mulf %86, %100 : vector<16x4xf32>
    %102 = arith.mulf %101, %101 : vector<16x4xf32>
    %cst_46 = arith.constant dense<0.000000e+00> : vector<16xf32>
    %103 = vector.multi_reduction <add>, %102, %cst_46 [1] : vector<16x4xf32> to vector<16xf32>
    %104 = vector.shape_cast %103 : vector<16xf32> to vector<16x1xf32>
    %105 = math.sqrt %104 : vector<16x1xf32>
    %cst_47 = arith.constant 1.000000e-15 : f32
    %106 = vector.broadcast %cst_47 : f32 to vector<16x1xf32>
    %107 = arith.maximumf %105, %106 : vector<16x1xf32>
    %cst_48 = arith.constant 0.995999991 : f32
    %108 = vector.broadcast %cst_48 : f32 to vector<16x1xf32>
    %109 = arith.cmpf ogt, %107, %108 : vector<16x1xf32>
    %110 = tpu.reciprocal %107 {approx = true} : vector<16x1xf32> -> vector<16x1xf32>
    %cst_49 = arith.constant 0.995999991 : f32
    %111 = vector.broadcast %cst_49 : f32 to vector<16x1xf32>
    %112 = arith.mulf %111, %110 : vector<16x1xf32>
    %113 = vector.broadcast %112 : vector<16x1xf32> to vector<16x4xf32>
    %114 = arith.mulf %101, %113 : vector<16x4xf32>
    %115 = vector.shape_cast %109 : vector<16x1xi1> to vector<16x1xi1>
    %116 = vector.broadcast %115 : vector<16x1xi1> to vector<16x4xi1>
    %117 = arith.select %116, %114, %101 : vector<16x4xi1>, vector<16x4xf32>
    %cst_50 = arith.constant dense<0xFF800000> : vector<16xf32>
    %118 = vector.multi_reduction <maximumf>, %117, %cst_50 [1] : vector<16x4xf32> to vector<16xf32>
    %119 = vector.shape_cast %118 : vector<16xf32> to vector<16x1xf32>
    %120 = vector.broadcast %119 : vector<16x1xf32> to vector<16x4xf32>
    %121 = arith.subf %117, %120 : vector<16x4xf32>
    %122 = math.exp %121 : vector<16x4xf32>
    %cst_51 = arith.constant dense<0.000000e+00> : vector<16xf32>
    %123 = vector.multi_reduction <add>, %122, %cst_51 [1] : vector<16x4xf32> to vector<16xf32>
    %124 = vector.shape_cast %123 : vector<16xf32> to vector<16x1xf32>
    %125 = math.log %124 : vector<16x1xf32>
    %126 = vector.broadcast %125 : vector<16x1xf32> to vector<16x4xf32>
    %127 = arith.subf %121, %126 : vector<16x4xf32>
    %c0_52 = arith.constant 0 : index
    %c0_53 = arith.constant 0 : index
    %128 = vector.load %arg5[%c0_52, %c0_53] : memref<16x4xf32, #tpu.memory_space<vmem>>, vector<16x4xf32>
    tpu.vector_store %arg5[%c0_52, %c0_53], %127 {strides = array<i32>} : memref<16x4xf32, #tpu.memory_space<vmem>>, vector<16x4xf32>,
    return
  }
}

</mosaic_0001>

<bundles_post_ra>
// kernel: gcn2_hbpu_forward.1
= control target key start
LH: loop header
LB: loop body
LE: loop exit
PB: predicated region body
PF: predicated region fallthrough
CT: control target
= control target key end

     0   :  { %vm27_vm0 = vcmask 64512   ;;  %vm61_vm1 = vcmask 130048   ;;  %s958_s2 = inlined_call_operand.vmem [shape: f32[48,16], index: 2, kind: input, shape index: {}]   ;;  %s959_s0 = inlined_call_operand.vmem [shape: f32[16,8], index: 0, kind: input, shape index: {}]   ;;  %s960_s1 = inlined_call_operand.vmem [shape: f32[16,16], index: 1, kind: input, shape index: {}]   ;;  %s961_s3 = inlined_call_operand.vmem [shape: f32[16,512], index: 3, kind: input, shape index: {}]   ;;  %s962_s4 = inlined_call_operand.vmem [shape: f32[257,4], index: 4, kind: input, shape index: {}]   ;;  %s963_s5 = inlined_call_operand.vmem [shape: f32[16,4], index: 5, kind: output, shape index: {}]  }
   0x1   :  { %v24_v0 = vld [vmem:[%s958_s2] sm:$0xff]  ;;  %v21_v2 = vld [vmem:[%s959_s0 + $0x8] sm:$0xff]  ;;  %v60_v12 = vld [vmem:[%s958_s2 + $0x18] sm:$0xff] }
   0x2   :  { %v20_v1 = vld [vmem:[%s959_s0] sm:$0xff]  ;;  %49 = vmatpush.msra.mxu0 %v24_v0  ;;  %v641_v4 = vld [vmem:[%s958_s2 + $0x8] ss:$0 sm:$0xff]  ;;  %639 = vmatpush.msra.mxu2 %v60_v12  ;;  %v59_v13 = vld [vmem:[%s958_s2 + $0x10] sm:$0xff] }
   0x3   :  { %619 = vmatmul.msk.f32.vlgmr.msra.gmra.mxu0 %vm27_vm0, %v20_v1  ;;  %v22_v10 = vld [vmem:[%s960_s1] sm:$0xff]  ;;  %v23_v11 = vld [vmem:[%s960_s1 + $0x8] sm:$0xff]  ;;  %v206_v42 = vld [vmem:[%s961_s3 + $0x30] sm:$0xff] }
   0x4   :  { %119 = vmatpush.msrb.mxu0 %v60_v12  ;;  %640 = vmatpush.msra.mxu2 %v59_v13  ;;  %v135_v32 = vld [vmem:[%s958_s2 + $0x28] sm:$0xff]  ;;  %v134_v33 = vld [vmem:[%s958_s2 + $0x20] sm:$0xff]  ;;  %v207_v43 = vld [vmem:[%s961_s3 + $0x38] sm:$0xff] }
   0x5   :  { %v204_v40 = vld [vmem:[%s961_s3 + $0x20] sm:$0xff]  ;;  %v205_v41 = vld [vmem:[%s961_s3 + $0x28] sm:$0xff]  ;;  %v202_v46 = vld [vmem:[%s961_s3 + $0x10] sm:$0xff] }
   0x6   :  { %120 = vmatpush.msrb.mxu0 %v59_v13  ;;  %228 = vmatpush.msra.mxu1 %v204_v40  ;;  %v200_v44 = vld [vmem:[%s961_s3] sm:$0xff]  ;;  %v201_v45 = vld [vmem:[%s961_s3 + $0x8] sm:$0xff]  ;;  %v203_v47 = vld [vmem:[%s961_s3 + $0x18] sm:$0xff] }
   0x7   :  { %251 = vmatpush.msrb.mxu2 %v205_v41  ;;  %v433_v12 = vld [vmem:[%s962_s4 + $0x78] sm:$0xff]  ;;  %v422_v41 = vld [vmem:[%s962_s4 + $0x20] sm:$0xff] }
   0x8   :  { %185 = vmatpush.msra.mxu0 %v135_v32  ;;  %229 = vmatpush.msra.mxu1 %v200_v44  ;;  %v449_v13 = vld [vmem:[%s962_s4 + $0xf8] sm:$0xff] }
   0x9   :  { %252 = vmatpush.msrb.mxu2 %v201_v45  ;;  %v425_v32 = vld [vmem:[%s962_s4 + $0x38] sm:$0xff] }
   0xa   :  { %186 = vmatpush.msra.mxu0 %v134_v33  ;;  %452 = vmatpush.msrb.mxu1 %v433_v12  ;;  %v441_v33 = vld [vmem:[%s962_s4 + $0xb8] sm:$0xff] }
   0xb   :  { %620 = vmatmul.msk.f32.gmra.mxu0 %vm27_vm0, %v21_v2  ;;  %vm500_vm0 = vcmask 31744  }
  0x80   :  { %v51_v3 = vpop.f32.mrf.mxu0 }
  0x81   :  { %v52_v6 = vadd.f32 %v641_v4, %v51_v3 }
  0x83   :  { %v57_v9 = vmax.f32 %v52_v6, 0.0 }
  0x85   :  { %v93_v15 = vmul.f32 0.1, %v57_v9 }
  0x88   :  { %v54_v5 = vpop.f32.mrf.mxu0 }
  0x89   :  { %v55_v7 = vadd.f32 %v641_v4, %v54_v5 }
  0x8b   :  { %v58_v8 = vmax.f32 %v55_v7, 0.0 }
  0x8d   :  { %82 = vmatpush.msra.mxu3 %v58_v8  ;;  %v94_v19 = vmul.f32 0.1, %v58_v8 }
  0x8f   :  { %83 = vmatpush.msra.mxu3 %v57_v9 }
  0x90   :  { %621 = vmatmul.msk.f32.vlgmr.msra.gmra.mxu3 %vm61_vm1, %v22_v10 }
  0x98   :  { %622 = vmatmul.msk.f32.gmra.mxu3 %vm61_vm1, %v23_v11 }
 0x113   :  { %v85_v14 = vpop.f32.mrf.mxu3 }
 0x114   :  { %v91_v16 = vmul.f32 0.9, %v85_v14  ;;  %v432_v14 = vld [vmem:[%s962_s4 + $0x70] sm:$0xff] }
 0x115   :  { %453 = vmatpush.msrb.mxu1 %v432_v14 }
 0x116   :  { %v95_v17 = vadd.f32 %v93_v15, %v91_v16  ;;  %v431_v16 = vld [vmem:[%s962_s4 + $0x68] sm:$0xff] }
 0x117   :  { %454 = vmatpush.msrb.mxu1 %v431_v16 }
 0x118   :  { %623 = vmatmul.msk.f32.vlgmr.msrb.gmra.mxu0 %vm61_vm1, %v95_v17  ;;  %v97_v27 = vmul.f32 0.5945349, %v95_v17  ;;  %v447_v17 = vld [vmem:[%s962_s4 + $0xe8] sm:$0xff] }
 0x119   :  { %297 = vmatpush.msrb.mxu0 %v207_v43 }
 0x11b   :  { %v88_v18 = vpop.f32.mrf.mxu3  ;;  %298 = vmatpush.msrb.mxu0 %v203_v47  ;;  %v437_v47 = vld [vmem:[%s962_s4 + $0x98] sm:$0xff] }
 0x11c   :  { %v92_v20 = vmul.f32 0.9, %v88_v18  ;;  %v430_v18 = vld [vmem:[%s962_s4 + $0x60] sm:$0xff] }
 0x11d   :  { %455 = vmatpush.msrb.mxu1 %v430_v18 }
 0x11e   :  { %v96_v21 = vadd.f32 %v94_v19, %v92_v20 }
 0x120   :  { %624 = vmatmul.msk.f32.vlgmr.msra.gmra.mxu2 %vm61_vm1, %v96_v21  ;;  %v98_v26 = vmul.f32 0.5945349, %v96_v21  ;;  %v429_v21 = vld [vmem:[%s962_s4 + $0x58] sm:$0xff] }
 0x121   :  { %475 = vmatpush.msra.mxu2 %v449_v13  ;;  %456 = vmatpush.msrb.mxu1 %v429_v21 }
 0x195   :  { %v122_v22 = vpop.f32.mrf.mxu0 }
 0x196   :  { %v128_v23 = vmul.f32 0.4054651, %v122_v22  ;;  %v445_v22 = vld [vmem:[%s962_s4 + $0xd8] sm:$0xff] }
 0x198   :  { %v130_v29 = vadd.f32 %v128_v23, %v97_v27  ;;  %v428_v23 = vld [vmem:[%s962_s4 + $0x50] sm:$0xff]  ;;  %v426_v27 = vld [vmem:[%s962_s4 + $0x40] sm:$0xff] }
 0x199   :  { %457 = vmatpush.msrb.mxu1 %v428_v23 }
 0x19a   :  { %v132_v31 = vmax.f32 %v130_v29, 0.0 }
 0x1a3   :  { %v125_v24 = vpop.f32.mrf.mxu2 }
 0x1a4   :  { %v129_v25 = vmul.f32 0.4054651, %v125_v24  ;;  %v444_v24 = vld [vmem:[%s962_s4 + $0xd0] sm:$0xff] }
 0x1a6   :  { %v131_v28 = vadd.f32 %v129_v25, %v98_v26  ;;  %v427_v25 = vld [vmem:[%s962_s4 + $0x48] sm:$0xff] }
 0x1a7   :  { %v443_v26 = vld [vmem:[%s962_s4 + $0xc8] sm:$0xff]  ;;  %458 = vmatpush.msrb.mxu1 %v427_v25 }
 0x1a8   :  { %v133_v30 = vmax.f32 %v131_v28, 0.0  ;;  %v442_v28 = vld [vmem:[%s962_s4 + $0xc0] sm:$0xff] }
 0x1a9   :  { %459 = vmatpush.msrb.mxu1 %v426_v27 }
 0x1aa   :  { %150 = vmatpush.msrb.mxu3 %v133_v30 }
 0x1ab   :  { %460 = vmatpush.msrb.mxu1 %v425_v32 }
 0x1ac   :  { %151 = vmatpush.msrb.mxu3 %v132_v31 }
 0x1ad   :  { %625 = vmatmul.msk.f32.vlgmr.msrb.gmra.mxu3 %vm61_vm1, %v22_v10 }
 0x1ae   :  { %274 = vmatpush.msra.mxu3 %v206_v42  ;;  %v438_v42 = vld [vmem:[%s962_s4 + $0xa0] sm:$0xff] }
 0x1b0   :  { %275 = vmatpush.msra.mxu3 %v202_v46  ;;  %v421_v46 = vld [vmem:[%s962_s4 + $0x18] sm:$0xff] }
 0x1b5   :  { %626 = vmatmul.msk.f32.gmra.mxu3 %vm61_vm1, %v23_v11 }
 0x230   :  { %v153_v34 = vpop.f32.mrf.mxu3 }
 0x231   :  { %v159_v35 = vmul.f32 0.9, %v153_v34 }
 0x233   :  { %v161_v36 = vadd.f32 %v159_v35, %v93_v15  ;;  %v448_v15 = vld [vmem:[%s962_s4 + $0xf0] sm:$0xff] }
 0x234   :  { %476 = vmatpush.msra.mxu2 %v448_v15  ;;  %v424_v35 = vld [vmem:[%s962_s4 + $0x30] sm:$0xff] }
 0x235   :  { %627 = vmatmul.msk.f32.vlgmr.msra.gmra.mxu0 %vm61_vm1, %v161_v36  ;;  %v163_v49 = vmul.f32 0.7768564, %v161_v36  ;;  %v440_v36 = vld [vmem:[%s962_s4 + $0xb0] sm:$0xff]  ;;  %461 = vmatpush.msrb.mxu1 %v424_v35 }
 0x236   :  { %477 = vmatpush.msra.mxu2 %v447_v17 }
 0x238   :  { %v156_v37 = vpop.f32.mrf.mxu3 }
 0x239   :  { %v160_v38 = vmul.f32 0.9, %v156_v37 }
 0x23b   :  { %v162_v39 = vadd.f32 %v160_v38, %v94_v19  ;;  %v446_v19 = vld [vmem:[%s962_s4 + $0xe0] sm:$0xff]  ;;  %v423_v38 = vld [vmem:[%s962_s4 + $0x28] sm:$0xff] }
 0x23c   :  { %478 = vmatpush.msra.mxu2 %v446_v19  ;;  %462 = vmatpush.msrb.mxu1 %v423_v38 }
 0x23d   :  { %628 = vmatmul.msk.f32.gmra.mxu0 %vm61_vm1, %v162_v39  ;;  %v164_v54 = vmul.f32 0.7768564, %v162_v39  ;;  %v439_v39 = vld [vmem:[%s962_s4 + $0xa8] sm:$0xff] }
 0x23e   :  { %479 = vmatpush.msra.mxu2 %v445_v22  ;;  %463 = vmatpush.msrb.mxu1 %v422_v41 }
 0x240   :  { %480 = vmatpush.msra.mxu2 %v444_v24  ;;  %464 = vmatpush.msrb.mxu1 %v421_v46 }
 0x242   :  { %481 = vmatpush.msra.mxu2 %v443_v26 }
 0x244   :  { %482 = vmatpush.msra.mxu2 %v442_v28 }
 0x246   :  { %483 = vmatpush.msra.mxu2 %v441_v33 }
 0x248   :  { %484 = vmatpush.msra.mxu2 %v440_v36 }
 0x24a   :  { %485 = vmatpush.msra.mxu2 %v439_v39 }
 0x24c   :  { %486 = vmatpush.msra.mxu2 %v438_v42 }
 0x24e   :  { %487 = vmatpush.msra.mxu2 %v437_v47 }
 0x2b2   :  { %v188_v48 = vpop.f32.mrf.mxu0 }
 0x2b3   :  { %v194_v50 = vmul.f32 0.22314355, %v188_v48 }
 0x2b5   :  { %v196_v51 = vadd.f32 %v194_v50, %v163_v49  ;;  %v420_v50 = vld [vmem:[%s962_s4 + $0x10] sm:$0xff] }
 0x2b6   :  { %465 = vmatpush.msrb.mxu1 %v420_v50 }
 0x2b7   :  { %v198_v52 = vmax.f32 %v196_v51, 0.0  ;;  %v436_v51 = vld [vmem:[%s962_s4 + $0x90] sm:$0xff] }
 0x2b8   :  { %488 = vmatpush.msra.mxu2 %v436_v51 }
 0x2b9   :  { %629 = vmatmul.msk.f32.vlgmr.msra.gmra.mxu1 %vm61_vm1, %v198_v52  ;;  %631 = vmatmul.msk.f32.vlgmr.msrb.gmra.mxu2 %vm61_vm1, %v198_v52 }
 0x2ba   :  { %633 = vmatmul.msk.f32.vlgmr.msra.gmra.mxu3 %vm61_vm1, %v198_v52  ;;  %635 = vmatmul.msk.f32.vlgmr.msrb.gmra.mxu0 %vm61_vm1, %v198_v52  ;;  %v191_v53 = vpop.f32.mrf.mxu0 }
 0x2bb   :  { %v195_v55 = vmul.f32 0.22314355, %v191_v53 }
 0x2bd   :  { %v197_v56 = vadd.f32 %v195_v55, %v164_v54  ;;  %v419_v54 = vld [vmem:[%s962_s4 + $0x8] sm:$0xff] }
 0x2be   :  { %v435_v55 = vld [vmem:[%s962_s4 + $0x88] sm:$0xff]  ;;  %466 = vmatpush.msrb.mxu1 %v419_v54 }
 0x2bf   :  { %v199_v57 = vmax.f32 %v197_v56, 0.0  ;;  %489 = vmatpush.msra.mxu2 %v435_v55 }
 0x2c1   :  { %630 = vmatmul.msk.f32.gmra.mxu1 %vm61_vm1, %v199_v57  ;;  %632 = vmatmul.msk.f32.gmra.mxu2 %vm61_vm1, %v199_v57 }
 0x2c2   :  { %634 = vmatmul.msk.f32.gmra.mxu3 %vm61_vm1, %v199_v57  ;;  %636 = vmatmul.msk.f32.gmra.mxu0 %vm61_vm1, %v199_v57 }
 0x336   :  { %v231_v59 = vpop.f32.mrf.mxu1 }
 0x337   :  { %v300_v58 = vpop.f32.mrf.mxu0 }
 0x33c   :  { %v254_v60 = vpop.f32.mrf.mxu2 }
 0x33d   :  { %v791_v61 = vmul.f32 %v300_v58, %v254_v60  ;;  %v277_v62 = vpop.f32.mrf.mxu3  ;;  %v434_v60 = vld [vmem:[%s962_s4 + $0x80] sm:$0xff] }
 0x33e   :  { %v793_v63 = vmul.f32 %v277_v62, %v231_v59  ;;  %v234_v5 = vpop.f32.mrf.mxu1  ;;  %v418_v59 = vld [vmem:[%s962_s4] sm:$0xff]  ;;  %490 = vmatpush.msra.mxu2 %v434_v60 }
 0x33f   :  { %v311_v0 = vmul.f32 %v791_v61, %v791_v61  ;;  %v303_v3 = vpop.f32.mrf.mxu0  ;;  %467 = vmatpush.msrb.mxu1 %v418_v59  ;;  %v642_v60 = vld [vmem:[%s962_s4 + $0x100] ss:$0 sm:$0xff] }
 0x340   :  { %v310_v1 = vmul.f32 %v793_v63, %v793_v63 }
 0x342   :  { %v314_v2 = vadd.f32 %v311_v0, %v310_v1 }
 0x344   :  { %315 = vadd.xlane.f32.xlu0 %v314_v2  ;;  %v257_v4 = vpop.f32.mrf.mxu2 }
 0x345   :  { %v799_v6 = vmul.f32 %v303_v3, %v257_v4  ;;  %v280_v7 = vpop.f32.mrf.mxu3 }
 0x346   :  { %v801_v8 = vmul.f32 %v280_v7, %v234_v5 }
 0x347   :  { %v313_v9 = vmul.f32 %v799_v6, %v799_v6 }
 0x348   :  { %v312_v10 = vmul.f32 %v801_v8, %v801_v8 }
 0x34a   :  { %v317_v11 = vadd.f32 %v313_v9, %v312_v10 }
 0x34c   :  { %318 = vadd.xlane.f32.xlu0 %v317_v11 }
 0x3b7   :  { %v831_v20 = vpop.xlane.xlu0 %315 }
 0x3b8   :  { %643 = vrsqrt.f32 %v831_v20  ;;  %vm327_vm2 = vcmp.eq.f32.partialorder %v831_v20, inf  ;;  %v330_v52 = vand.u32 2147483648, %v831_v20  ;;  %vm329_vm3 = vcmp.eq.f32.partialorder %v831_v20, 0.0 }
 0x3be   :  { %v644_v29 = vpop.eup %643 }
 0x3bf   :  { %v321_v30 = vmul.f32 %v644_v29, %v831_v20  ;;  %v859_v31 = vpop.xlane.xlu0 %318 }
 0x3c0   :  { %645 = vrsqrt.f32 %v859_v31  ;;  %vm339_vm4 = vcmp.eq.f32.partialorder %v859_v31, inf  ;;  %v342_v4 = vand.u32 2147483648, %v859_v31  ;;  %vm341_vm5 = vcmp.eq.f32.partialorder %v859_v31, 0.0 }
 0x3c1   :  { %v322_v34 = vmul.f32 %v644_v29, %v321_v30 }
 0x3c3   :  { %v323_v37 = vmul.f32 0.5, %v322_v34 }
 0x3c5   :  { %v324_v40 = vsub.f32 1.5, %v323_v37 }
 0x3c6   :  { %v646_v43 = vpop.eup %645 }
 0x3c7   :  { %v325_v44 = vmul.f32 %v644_v29, %v324_v40  ;;  %v333_v45 = vmul.f32 %v646_v43, %v859_v31 }
 0x3c9   :  { %v326_v48 = vmul.f32 %v325_v44, %v831_v20  ;;  %v334_v49 = vmul.f32 %v646_v43, %v333_v45 }
 0x3cb   :  { %v335_v53 = vmul.f32 0.5, %v334_v49  ;;  %v328_v56 = vsel %vm327_vm2, %v831_v20, %v326_v48 }
 0x3cc   :  { %v331_v57 = vsel %vm329_vm3, %v330_v52, %v328_v56 }
 0x3cd   :  { %v336_v58 = vsub.f32 1.5, %v335_v53  ;;  %v916_v62 = vmax.f32 %v331_v57, 1e-15 }
 0x3cf   :  { %v337_v0 = vmul.f32 %v646_v43, %v336_v58  ;;  %v364_v1 = vmin.f32 %v916_v62, 0.996  ;;  %vm346_vm14 = vcmp.gt.f32.partialorder %v916_v62, 0.996 }
 0x3d1   :  { %v338_v2 = vmul.f32 %v337_v0, %v859_v31  ;;  %v372_v3 = vsub.f32 1.0, %v364_v1  ;;  %v370_v20 = vadd.f32 1.0, %v364_v1 }
 0x3d3   :  { %647 = vrcp.f32 %v372_v3  ;;  %v340_v5 = vsel %vm339_vm4, %v859_v31, %v338_v2  ;;  %v385_v15 = vand.u32 2147483648, %v372_v3  ;;  %v383_v17 = vand.u32 2147483647, %v372_v3 }
 0x3d4   :  { %v343_v7 = vsel %vm341_vm5, %v342_v4, %v340_v5  ;;  %vm379_vm7 = vweird.f32 %v372_v3 }
 0x3d5   :  { %v924_v9 = vmax.f32 %v343_v7, 1e-15  ;;  %v386_v19 = vor.u32 1.1754944e-38, %v385_v15  ;;  %vm384_vm9 = vcmp.eq.f32.partialorder %v383_v17, 8.507059e+37 }
 0x3d7   :  { %v365_v11 = vmin.f32 %v924_v9, 0.996  ;;  %vm347_vm15 = vcmp.gt.f32.partialorder %v924_v9, 0.996 }
 0x3d9   :  { %v648_v10 = vpop.eup %647  ;;  %v373_v13 = vsub.f32 1.0, %v365_v11  ;;  %v371_v35 = vadd.f32 1.0, %v365_v11 }
 0x3da   :  { %v375_v12 = vmul.f32 %v648_v10, %v372_v3  ;;  %vm380_vm6 = vweird.f32 %v648_v10 }
 0x3db   :  { %649 = vrcp.f32 %v373_v13  ;;  %vm381_vm8 = vmor %vm379_vm7, %vm380_vm6  ;;  %v400_v28 = vand.u32 2147483648, %v373_v13  ;;  %v398_v30 = vand.u32 2147483647, %v373_v13  ;;  %vm394_vm11 = vweird.f32 %v373_v13 }
 0x3dc   :  { %v376_v14 = vsub.f32 1.0, %v375_v12  ;;  %651 = vrcp.f32 %v916_v62 }
 0x3dd   :  { %v401_v33 = vor.u32 1.1754944e-38, %v400_v28  ;;  %vm399_vm13 = vcmp.eq.f32.partialorder %v398_v30, 8.507059e+37 }
 0x3de   :  { %v377_v16 = vmul.f32 %v648_v10, %v376_v14 }
 0x3e0   :  { %v378_v18 = vadd.f32 %v648_v10, %v377_v16 }
 0x3e1   :  { %v650_v22 = vpop.eup %649 }
 0x3e2   :  { %v382_v21 = vsel %vm381_vm8, %v648_v10, %v378_v18  ;;  %v390_v25 = vmul.f32 %v650_v22, %v373_v13  ;;  %v652_v27 = vpop.eup %651  ;;  %vm395_vm10 = vweird.f32 %v650_v22 }
 0x3e3   :  { %v387_v23 = vsel %vm384_vm9, %v386_v19, %v382_v21  ;;  %v350_v31 = vmul.f32 0.996, %v652_v27  ;;  %vm396_vm12 = vmor %vm394_vm11, %vm395_vm10 }
 0x3e4   :  { %v388_v24 = vmul.f32 %v387_v23, %v370_v20  ;;  %v391_v26 = vsub.f32 1.0, %v390_v25 }
 0x3e5   :  { %v352_v39 = vmul.f32 %v350_v31, %v793_v63  ;;  %v353_v40 = vmul.f32 %v350_v31, %v791_v61 }
 0x3e6   :  { %653 = vlog2.f32 %v388_v24  ;;  %v392_v29 = vmul.f32 %v650_v22, %v391_v26 }
 0x3e7   :  { %655 = vrcp.f32 %v364_v1  ;;  %v360_v46 = vsel %vm346_vm14, %v352_v39, %v793_v63  ;;  %v361_v47 = vsel %vm346_vm14, %v353_v40, %v791_v61 }
 0x3e8   :  { %v393_v32 = vadd.f32 %v650_v22, %v392_v29  ;;  %657 = vrcp.f32 %v924_v9 }
 0x3ea   :  { %v397_v36 = vsel %vm396_vm12, %v650_v22, %v393_v32 }
 0x3eb   :  { %v402_v38 = vsel %vm399_vm13, %v401_v33, %v397_v36 }
 0x3ec   :  { %v654_v34 = vpop.eup %653  ;;  %v403_v41 = vmul.f32 %v402_v38, %v371_v35 }
 0x3ed   :  { %v405_v37 = vmul.f32 0.6931472, %v654_v34  ;;  %v656_v43 = vpop.eup %655 }
 0x3ee   :  { %659 = vlog2.f32 %v403_v41  ;;  %v658_v44 = vpop.eup %657 }
 0x3ef   :  { %v408_v42 = vmul.f32 0.5, %v405_v37  ;;  %v351_v50 = vmul.f32 0.996, %v658_v44  ;;  %661 = vrcp.f32 %v365_v11 }
 0x3f1   :  { %v412_v45 = vmul.f32 %v656_v43, %v408_v42  ;;  %v354_v53 = vmul.f32 %v351_v50, %v801_v8  ;;  %v355_v54 = vmul.f32 %v351_v50, %v799_v6 }
 0x3f3   :  { %v414_v48 = vmul.f32 %v412_v45, %v360_v46  ;;  %v415_v49 = vmul.f32 %v412_v45, %v361_v47  ;;  %v362_v63 = vsel %vm347_vm15, %v354_v53, %v801_v8  ;;  %v363_v61 = vsel %vm347_vm15, %v355_v54, %v799_v6 }
 0x3f4   :  { %v660_v51 = vpop.eup %659 }
 0x3f5   :  { %468 = vmatmul.f32.vlgmr.msrb.gmra.mxu1 %v414_v48  ;;  %491 = vmatmul.f32.vlgmr.msra.gmra.mxu2 %v415_v49  ;;  %v407_v52 = vmul.f32 0.6931472, %v660_v51  ;;  %v662_v56 = vpop.eup %661 }
 0x3f7   :  { %v409_v55 = vmul.f32 0.5, %v407_v52 }
 0x3f9   :  { %v413_v57 = vmul.f32 %v662_v56, %v409_v55 }
 0x3fb   :  { %v416_v58 = vmul.f32 %v413_v57, %v362_v63  ;;  %v417_v59 = vmul.f32 %v413_v57, %v363_v61 }
 0x3fd   :  { %471 = vmatmul.f32.gmra.mxu1 %v416_v58  ;;  %494 = vmatmul.f32.gmra.mxu2 %v417_v59 }
 0x472   :  { %v469_v62 = vpop.f32.mrf.mxu1 }
 0x473   :  { %v470_v0 = vadd.f32 %v642_v60, %v469_v62 }
 0x478   :  { %v492_v1 = vpop.f32.mrf.mxu2 }
 0x479   :  { %v493_v2 = vadd.f32 %v492_v1, %v470_v0 }
 0x47a   :  { %v472_v5 = vpop.f32.mrf.mxu1 }
 0x47b   :  { %v498_v3 = vmul.f32 %v493_v2, %v493_v2  ;;  %v473_v8 = vadd.f32 %v642_v60, %v472_v5 }
 0x47d   :  { %v501_v4 = vsel %vm500_vm0, %v498_v3, 0.0 }
 0x47e   :  { %502 = vadd.xlane.f32.xlu1 %v501_v4 }
 0x480   :  { %v495_v6 = vpop.f32.mrf.mxu2 }
 0x481   :  { %v496_v7 = vadd.f32 %v495_v6, %v473_v8 }
 0x483   :  { %v499_v9 = vmul.f32 %v496_v7, %v496_v7 }
 0x485   :  { %v504_v10 = vsel %vm500_vm0, %v499_v9, 0.0 }
 0x486   :  { %505 = vadd.xlane.f32.xlu1 %v504_v10 }
 0x4f1   :  { %v503_v11 = vpop.xlane.xlu1 %502 }
 0x4f2   :  { %663 = vrsqrt.f32 %v503_v11  ;;  %vm514_vm1 = vcmp.eq.f32.partialorder %v503_v11, inf  ;;  %v517_v22 = vand.u32 2147483648, %v503_v11  ;;  %vm516_vm2 = vcmp.eq.f32.partialorder %v503_v11, 0.0 }
 0x4f8   :  { %v664_v12 = vpop.eup %663 }
 0x4f9   :  { %v508_v13 = vmul.f32 %v664_v12, %v503_v11  ;;  %v506_v15 = vpop.xlane.xlu1 %505 }
 0x4fa   :  { %665 = vrsqrt.f32 %v506_v15  ;;  %vm526_vm3 = vcmp.eq.f32.partialorder %v506_v15, inf  ;;  %v529_v31 = vand.u32 2147483648, %v506_v15  ;;  %vm528_vm4 = vcmp.eq.f32.partialorder %v506_v15, 0.0 }
 0x4fb   :  { %v509_v14 = vmul.f32 %v664_v12, %v508_v13 }
 0x4fd   :  { %v510_v16 = vmul.f32 0.5, %v509_v14 }
 0x4ff   :  { %v511_v17 = vsub.f32 1.5, %v510_v16 }
 0x500   :  { %v666_v19 = vpop.eup %665 }
 0x501   :  { %v512_v18 = vmul.f32 %v664_v12, %v511_v17  ;;  %v520_v21 = vmul.f32 %v666_v19, %v506_v15 }
 0x503   :  { %v513_v20 = vmul.f32 %v512_v18, %v503_v11  ;;  %v521_v24 = vmul.f32 %v666_v19, %v520_v21 }
 0x505   :  { %v515_v23 = vsel %vm514_vm1, %v503_v11, %v513_v20  ;;  %v522_v26 = vmul.f32 0.5, %v521_v24 }
 0x506   :  { %v518_v25 = vsel %vm516_vm2, %v517_v22, %v515_v23 }
 0x507   :  { %v531_v27 = vmax.f32 %v518_v25, 1e-15  ;;  %v523_v28 = vsub.f32 1.5, %v522_v26 }
 0x509   :  { %667 = vtanh.f32 %v531_v27  ;;  %v524_v29 = vmul.f32 %v666_v19, %v523_v28 }
 0x50a   :  { %669 = vrcp.f32 %v531_v27 }
 0x50b   :  { %v525_v30 = vmul.f32 %v524_v29, %v506_v15 }
 0x50d   :  { %v527_v33 = vsel %vm526_vm3, %v506_v15, %v525_v30 }
 0x50e   :  { %v530_v35 = vsel %vm528_vm4, %v529_v31, %v527_v33 }
 0x50f   :  { %v668_v32 = vpop.eup %667  ;;  %v532_v37 = vmax.f32 %v530_v35, 1e-15 }
 0x510   :  { %v670_v34 = vpop.eup %669 }
 0x511   :  { %v537_v36 = vmul.f32 %v670_v34, %v668_v32  ;;  %671 = vtanh.f32 %v532_v37 }
 0x512   :  { %673 = vrcp.f32 %v532_v37 }
 0x513   :  { %v539_v38 = vmul.f32 %v537_v36, %v493_v2 }
 0x515   :  { %v541_v39 = vmul.f32 %v539_v38, %v539_v38 }
 0x517   :  { %v543_v40 = vsel %vm500_vm0, %v541_v39, 0.0  ;;  %v672_v41 = vpop.eup %671 }
 0x518   :  { %544 = vadd.xlane.f32.xlu2 %v543_v40  ;;  %v674_v42 = vpop.eup %673 }
 0x519   :  { %v538_v43 = vmul.f32 %v674_v42, %v672_v41 }
 0x51b   :  { %v540_v44 = vmul.f32 %v538_v43, %v496_v7 }
 0x51d   :  { %v542_v45 = vmul.f32 %v540_v44, %v540_v44 }
 0x51f   :  { %v546_v46 = vsel %vm500_vm0, %v542_v45, 0.0 }
 0x520   :  { %547 = vadd.xlane.f32.xlu2 %v546_v46 }
 0x58b   :  { %v545_v47 = vpop.xlane.xlu2 %544 }
 0x58c   :  { %675 = vrsqrt.f32 %v545_v47  ;;  %vm556_vm5 = vcmp.eq.f32.partialorder %v545_v47, inf  ;;  %v559_v63 = vand.u32 2147483648, %v545_v47  ;;  %vm558_vm6 = vcmp.eq.f32.partialorder %v545_v47, 0.0 }
 0x592   :  { %v676_v48 = vpop.eup %675 }
 0x593   :  { %v550_v49 = vmul.f32 %v676_v48, %v545_v47  ;;  %v548_v51 = vpop.xlane.xlu2 %547 }
 0x594   :  { %677 = vrsqrt.f32 %v548_v51  ;;  %vm568_vm7 = vcmp.eq.f32.partialorder %v548_v51, inf  ;;  %v571_v3 = vand.u32 2147483648, %v548_v51  ;;  %vm570_vm8 = vcmp.eq.f32.partialorder %v548_v51, 0.0 }
 0x595   :  { %v551_v50 = vmul.f32 %v676_v48, %v550_v49 }
 0x597   :  { %v552_v52 = vmul.f32 0.5, %v551_v50 }
 0x599   :  { %v553_v53 = vsub.f32 1.5, %v552_v52 }
 0x59a   :  { %v678_v55 = vpop.eup %677 }
 0x59b   :  { %v554_v54 = vmul.f32 %v676_v48, %v553_v53  ;;  %v562_v56 = vmul.f32 %v678_v55, %v548_v51 }
 0x59d   :  { %v555_v57 = vmul.f32 %v554_v54, %v545_v47  ;;  %v563_v61 = vmul.f32 %v678_v55, %v562_v56 }
 0x59f   :  { %v557_v58 = vsel %vm556_vm5, %v545_v47, %v555_v57  ;;  %v564_v62 = vmul.f32 0.5, %v563_v61 }
 0x5a0   :  { %v560_v59 = vsel %vm558_vm6, %v559_v63, %v557_v58 }
 0x5a1   :  { %v573_v60 = vmax.f32 %v560_v59, 1e-15  ;;  %v565_v0 = vsub.f32 1.5, %v564_v62 }
 0x5a3   :  { %679 = vrcp.f32 %v573_v60  ;;  %v566_v1 = vmul.f32 %v678_v55, %v565_v0  ;;  %vm575_vm9 = vcmp.gt.f32.partialorder %v573_v60, 0.996 }
 0x5a5   :  { %v567_v2 = vmul.f32 %v566_v1, %v548_v51 }
 0x5a7   :  { %v569_v5 = vsel %vm568_vm7, %v548_v51, %v567_v2 }
 0x5a8   :  { %v572_v6 = vsel %vm570_vm8, %v571_v3, %v569_v5 }
 0x5a9   :  { %v680_v4 = vpop.eup %679  ;;  %v574_v7 = vmax.f32 %v572_v6, 1e-15 }
 0x5aa   :  { %v579_v8 = vmul.f32 0.996, %v680_v4 }
 0x5ab   :  { %681 = vrcp.f32 %v574_v7  ;;  %vm576_vm10 = vcmp.gt.f32.partialorder %v574_v7, 0.996 }
 0x5ac   :  { %v581_v9 = vmul.f32 %v579_v8, %v539_v38 }
 0x5ae   :  { %v587_v10 = vsel %vm575_vm9, %v581_v9, %v539_v38 }
 0x5af   :  { %v589_v11 = vsel %vm500_vm0, %v587_v10, -inf }
 0x5b0   :  { %590 = vmax.xlane.f32.xlu0 %v589_v11 }
 0x5b1   :  { %v682_v12 = vpop.eup %681 }
 0x5b2   :  { %v580_v13 = vmul.f32 0.996, %v682_v12 }
 0x5b4   :  { %v582_v14 = vmul.f32 %v580_v13, %v540_v44 }
 0x5b6   :  { %v588_v15 = vsel %vm576_vm10, %v582_v14, %v540_v44 }
 0x5b7   :  { %v592_v16 = vsel %vm500_vm0, %v588_v15, -inf }
 0x5b8   :  { %593 = vmax.xlane.f32.xlu1 %v592_v16 }
 0x623   :  { %v591_v17 = vpop.xlane.xlu0 %590 }
 0x624   :  { %v595_v18 = vsub.f32 %v587_v10, %v591_v17 }
 0x626   :  { %v597_v19 = vmul.f32 1.442695, %v595_v18 }
 0x628   :  { %683 = vpow2.f32 %v597_v19 }
 0x62b   :  { %v594_v20 = vpop.xlane.xlu1 %593 }
 0x62c   :  { %v596_v22 = vsub.f32 %v588_v15, %v594_v20 }
 0x62e   :  { %v684_v21 = vpop.eup %683  ;;  %v599_v24 = vmul.f32 1.442695, %v596_v22 }
 0x62f   :  { %v601_v23 = vsel %vm500_vm0, %v684_v21, 0.0 }
 0x630   :  { %602 = vadd.xlane.f32.xlu2 %v601_v23  ;;  %685 = vpow2.f32 %v599_v24 }
 0x636   :  { %v686_v25 = vpop.eup %685 }
 0x637   :  { %v604_v26 = vsel %vm500_vm0, %v686_v25, 0.0 }
 0x638   :  { %605 = vadd.xlane.f32.xlu0 %v604_v26 }
 0x6a3   :  { %v603_v27 = vpop.xlane.xlu2 %602 }
 0x6a4   :  { %687 = vlog2.f32 %v603_v27 }
 0x6aa   :  { %v688_v28 = vpop.eup %687 }
 0x6ab   :  { %v608_v29 = vmul.f32 0.6931472, %v688_v28  ;;  %v606_v31 = vpop.xlane.xlu0 %605 }
 0x6ac   :  { %689 = vlog2.f32 %v606_v31 }
 0x6ad   :  { %v611_v30 = vsub.f32 %v595_v18, %v608_v29 }
 0x6af   :  { %613 = vst.msk [vmem:[%s963_s5] sm:$0xff] %vm500_vm0, %v611_v30 }
 0x6b2   :  { %v690_v32 = vpop.eup %689 }
 0x6b3   :  { %v610_v33 = vmul.f32 0.6931472, %v690_v32 }
 0x6b5   :  { %v612_v34 = vsub.f32 %v596_v22, %v610_v33 }
 0x6b7   :  { %614 = vst.msk [vmem:[%s963_s5 + $0x8] sm:$0xff] %vm500_vm0, %v612_v34 }

</bundles_post_ra>
